<compile_context>
chip_gen: v7x
topology: tpu7x:2x2x1
jax: 0.10.0
libtpu: 0.0.40
codegen_flags: <defaults>
</compile_context>

<pallas_src>
import functools

import jax
import jax.numpy as jnp
import numpy as np
from jax.experimental import pallas as pl
from jax.experimental.pallas import tpu as pltpu


def _round_up(x, m):
    return (x + m - 1) // m * m


def _tpu_info():
    """Return (vmem_capacity_bytes, multi_tensorcore?) with safe fallbacks."""
    vmem_cap = 64 * 1024 * 1024          # conservative (v7x per-core) fallback
    multi_tc = False
    try:
        info = pltpu.get_tpu_info()
        vmem_cap = int(getattr(info, "vmem_capacity_bytes", vmem_cap))
    except Exception:
        pass
    try:
        kind = jax.devices()[0].device_kind.lower()
        # Chips where the "parallel" grid axis can actually split across TensorCores.
        multi_tc = any(tag in kind for tag in ("v4", "v5p", "v7"))
    except Exception:
        pass
    return vmem_cap, multi_tc


def _tile_vmem_bytes(block_b, block_n, d, feat_bytes, return_logits):
    """Rough VMEM footprint of one grid step: double-buffered pipelined operands,
    single-buffered scratch, and in-kernel (TB, TN) temporaries."""
    est = 2 * (block_b * d * 4                 # inputs tile (f32), double-buffered
               + block_n * d * feat_bytes)     # bank tile, double-buffered
    est += 2 * block_b * 128 * 4               # lse output tile (lane-padded (TB,1))
    if return_logits:
        est += 2 * block_b * block_n * 4       # logits output tile
    est += block_b * d * feat_bytes            # cached normalized-input scratch
    est += 2 * block_b * 128 * 4               # m/l scratch (lane-padded)
    est += 2 * block_b * block_n * 4           # in-kernel temporaries (logits, p)
    return est


def _cm_kernel(inputs_ref, features_ref, *refs,
               inv_temp, eps, n_valid, block_n, mask_columns, return_logits):
    if return_logits:
        lse_ref, logits_ref, xn_sc, m_sc, l_sc = refs
    else:
        lse_ref, xn_sc, m_sc, l_sc = refs
        logits_ref = None

    j = pl.program_id(1)

    # ---- once per B tile: normalize, fold 1/temp, cast to bank dtype, init LSE ----
    # max(||x||, eps) == sqrt(max(sum(x^2), eps^2)); rsqrt goes to the EUP slot.
    @pl.when(j == 0)
    def _init():
        x = inputs_ref[...].astype(jnp.float32)
        sumsq = jnp.sum(x * x, axis=1, keepdims=True)
        scale = jax.lax.rsqrt(jnp.maximum(sumsq, eps * eps)) * inv_temp
        xn_sc[...] = (x * scale).astype(xn_sc.dtype)
        m_sc[...] = jnp.full_like(m_sc, -jnp.inf)
        l_sc[...] = jnp.zeros_like(l_sc)

    # ---- MXU matmul vs. the (TN, D) bank tile; contract last dims (no f.T) -------
    f = features_ref[...]
    logits = jax.lax.dot_general(
        xn_sc[...], f,
        dimension_numbers=(((1,), (1,)), ((), ())),
        preferred_element_type=jnp.float32)            # (TB, TN), already / temp

    if mask_columns:
        # (1, TN) additive bias row: zero on valid columns, -1e30 on padded ones.
        col_row = jax.lax.broadcasted_iota(jnp.int32, (1, block_n), 1) + j * block_n
        bias = jnp.where(col_row < n_valid, jnp.float32(0.0), jnp.float32(-1e30))
        logits = logits + bias

    if logits_ref is not None:
        logits_ref[...] = logits.astype(logits_ref.dtype)

    # ---- online (flash) log-sum-exp ------------------------------------------------
    m_new = jnp.maximum(m_sc[...], jnp.max(logits, axis=1, keepdims=True))
    alpha = jnp.exp(m_sc[...] - m_new)
    p = jnp.exp(logits - m_new)
    l_sc[...] = alpha * l_sc[...] + jnp.sum(p, axis=1, keepdims=True)
    m_sc[...] = m_new

    # ---- finalize per-sample log-sum-exp on the last N tile ------------------------
    @pl.when(j == pl.num_programs(1) - 1)
    def _finalize():
        lse_ref[...] = m_sc[...] + jnp.log(l_sc[...])


def cluster_memory_forward(inputs, features, targets, *, temp=0.05, eps=1e-12,
                           block_b=None, block_n=None, return_logits=True,
                           logits_dtype=jnp.float32, bank_buffer_count=None):
    """Pallas ClusterMemory.forward (mode='cm', reweight=False).

    Returns (loss, logits) with logits = normalize(inputs) @ features.T / temp,
    or just `loss` when return_logits=False (skips the (B, N) HBM store).
    `features` may be float32 or bfloat16 (bf16 halves bank HBM traffic; the matmul
    always accumulates in float32). `logits_dtype=jnp.bfloat16` halves the logits
    HBM write when full logits are needed.
    """
    B, D = inputs.shape
    N, D2 = features.shape
    assert D == D2
    assert N >= 1
    feat_bytes = jnp.dtype(features.dtype).itemsize

    # ---- per-generation tile policy: lane-dense TN (mult of 128), TB mult of 8 ----
    vmem_cap, multi_tc = _tpu_info()
    budget = int(0.65 * vmem_cap)

    if block_b is None:
        block_b = min(_round_up(B, 8), 1024)
        # Only multi-TC chips can shard the "parallel" B axis across cores; on
        # single-TC v5e/v6e splitting B just re-streams the bank for nothing.
        if multi_tc and block_b >= 16 and _round_up(B, block_b) // block_b < 2:
            block_b = _round_up(block_b // 2, 8)
    if block_n is None:
        block_n = min(_round_up(N, 128), 2048)
    while block_n > 128 and _tile_vmem_bytes(block_b, block_n, D, feat_bytes,
                                             return_logits) > budget:
        block_n = max(128, _round_up(block_n // 2, 128))
    while block_b > 8 and _tile_vmem_bytes(block_b, block_n, D, feat_bytes,
                                           return_logits) > budget:
        block_b = max(8, _round_up(block_b // 2, 8))

    B_pad = _round_up(B, block_b)
    N_pad = _round_up(N, block_n)

    x = jnp.asarray(inputs, jnp.float32)
    f = features
    if B_pad != B:
        x = jnp.pad(x, ((0, B_pad - B), (0, 0)))
    if N_pad != N:
        f = jnp.pad(f, ((0, N_pad - N), (0, 0)))

    grid = (B_pad // block_b, N_pad // block_n)

    kernel = functools.partial(
        _cm_kernel,
        inv_temp=float(1.0 / temp), eps=float(eps),
        n_valid=int(N), block_n=int(block_n),
        mask_columns=(N_pad != N), return_logits=return_logits)

    bank_kwargs = {}
    if bank_buffer_count is not None and int(bank_buffer_count) != 2:
        bank_kwargs["pipeline_mode"] = pl.Buffered(int(bank_buffer_count))
    in_specs = [
        pl.BlockSpec((block_b, D), lambda i, j: (i, 0)),                  # inputs tile
        pl.BlockSpec((block_n, D), lambda i, j: (j, 0), **bank_kwargs),   # bank tile
    ]

    lse_spec = pl.BlockSpec((block_b, 1), lambda i, j: (i, 0))
    if return_logits:
        out_shape = (jax.ShapeDtypeStruct((B_pad, 1), jnp.float32),
                     jax.ShapeDtypeStruct((B_pad, N_pad), logits_dtype))
        out_specs = (lse_spec,
                     pl.BlockSpec((block_b, block_n), lambda i, j: (i, j)))
    else:
        out_shape = jax.ShapeDtypeStruct((B_pad, 1), jnp.float32)
        out_specs = lse_spec

    est = _tile_vmem_bytes(block_b, block_n, D, feat_bytes, return_logits)
    vmem_limit = int(min(max(int(1.5 * est), 32 * 1024 * 1024),
                         int(0.8 * vmem_cap)))

    result = pl.pallas_call(
        kernel,
        out_shape=out_shape,
        grid_spec=pltpu.PrefetchScalarGridSpec(
            num_scalar_prefetch=0,
            grid=grid,
            in_specs=in_specs,
            out_specs=out_specs,
            scratch_shapes=[
                pltpu.VMEM((block_b, D), features.dtype),   # cached normalized input
                pltpu.VMEM((block_b, 1), jnp.float32),      # m (running max)
                pltpu.VMEM((block_b, 1), jnp.float32),      # l (running sum)
            ],
        ),
        compiler_params=pltpu.CompilerParams(
            dimension_semantics=("parallel", "arbitrary"),
            vmem_limit_bytes=vmem_limit),
    )(x, f)

    # ---- target logit via a tiny O(B*D) gather + row-dot in the wrapper -----------
    # (pulled out of the kernel's inner loop per the perf review; uses the same
    # cast point as the kernel so bf16 banks compare tightly)
    x32 = jnp.asarray(inputs, jnp.float32)
    sumsq = jnp.sum(x32 * x32, axis=1, keepdims=True)
    scale = jax.lax.rsqrt(jnp.maximum(sumsq, float(eps) * float(eps))) * (1.0 / temp)
    x_n = (x32 * scale).astype(features.dtype)
    tgt = jnp.asarray(targets, jnp.int32)
    f_tgt = jnp.take(features, tgt, axis=0)                              # (B, D)
    t_logit = jnp.sum(x_n.astype(jnp.float32) * f_tgt.astype(jnp.float32), axis=1)

    if return_logits:
        lse_vec, logits_pad = result
        loss = jnp.mean(lse_vec[:B, 0] - t_logit)
        return loss, logits_pad[:B, :N]
    lse_vec = result
    return jnp.mean(lse_vec[:B, 0] - t_logit)


def _reference_forward(inputs, features, targets, temp=0.05, eps=1e-12):
    """Pure-JAX reference for the PyTorch forward (normalize -> mm -> /temp -> CE)."""
    inv_temp = 1.0 / temp
    x = inputs.astype(jnp.float32)
    sumsq = jnp.sum(x * x, axis=1, keepdims=True)
    scale = jax.lax.rsqrt(jnp.maximum(sumsq, eps * eps)) * inv_temp
    x_n = (x * scale).astype(features.dtype)
    logits = jax.lax.dot_general(
        x_n, features,
        dimension_numbers=(((1,), (1,)), ((), ())),
        precision=jax.lax.Precision.HIGHEST,
        preferred_element_type=jnp.float32)
    logz = jax.scipy.special.logsumexp(logits, axis=1)
    tgt_logit = jnp.take_along_axis(logits, targets[:, None].astype(jnp.int32),
                                    axis=1)[:, 0]
    return jnp.mean(logz - tgt_logit), logits


if __name__ == "__main__":
    # Small but tile-exercising shapes: batch=12 (padded to 16), feat dim=128,
    # bank size=200 clusters (padded to 256 -> exercises the column pad-bias path).
    B, D, N = 12, 128, 200
    temp = 0.05

    key = jax.random.PRNGKey(0)
    k_in, k_feat, k_tgt = jax.random.split(key, 3)

    inputs = jax.random.normal(k_in, (B, D), dtype=jnp.float32)
    # ClusterMemory.__init__ registers `features` as zeros(num_samples, num_features);
    # use deterministic normalized random rows here so logits are non-degenerate.
    feats = jax.random.normal(k_feat, (N, D), dtype=jnp.float32)
    feats = feats / jnp.linalg.norm(feats, axis=1, keepdims=True)
    targets = jax.random.randint(k_tgt, (B,), 0, N, dtype=jnp.int32)
    # cameras are unused by the forward pass for mode='cm' (backward-only state update).

    # ---- float32 bank ----
    loss, logits = cluster_memory_forward(inputs, feats, targets, temp=temp)
    jax.block_until_ready(loss)
    ref_loss, ref_logits = _reference_forward(inputs, feats, targets, temp=temp)
    np.testing.assert_allclose(np.asarray(logits), np.asarray(ref_logits),
                               rtol=1e-4, atol=1e-4)
    np.testing.assert_allclose(float(loss), float(ref_loss), rtol=1e-4, atol=1e-4)

    # ---- loss-only variant (skips the (B, N) logits HBM store) ----
    loss_only = cluster_memory_forward(inputs, feats, targets, temp=temp,
                                       return_logits=False)
    jax.block_until_ready(loss_only)
    np.testing.assert_allclose(float(loss_only), float(ref_loss),
                               rtol=1e-4, atol=1e-4)

    # ---- bf16 bank streaming (halves bank HBM traffic; f32 MXU accumulator) ----
    feats_bf16 = feats.astype(jnp.bfloat16)
    loss_bf, logits_bf = cluster_memory_forward(inputs, feats_bf16, targets, temp=temp)
    jax.block_until_ready(loss_bf)
    ref_loss_bf, ref_logits_bf = _reference_forward(inputs, feats_bf16, targets,
                                                    temp=temp)
    np.testing.assert_allclose(np.asarray(logits_bf), np.asarray(ref_logits_bf),
                               rtol=2e-3, atol=2e-3)
    np.testing.assert_allclose(float(loss_bf), float(ref_loss_bf),
                               rtol=2e-3, atol=2e-3)

    print("KERNEL_OK")
</pallas_src>

<mosaic_0001>
module attributes {stable_mosaic.version = 11 : i64} {
  func.func @_cm_kernel(%arg0: i32, %arg1: i32, %arg2: memref<16x128xf32, #tpu.memory_space<vmem>>, %arg3: memref<256x128xf32, #tpu.memory_space<vmem>>, %arg4: memref<16x1xf32, #tpu.memory_space<vmem>>, %arg5: memref<16x256xf32, #tpu.memory_space<vmem>>, %arg6: memref<16x128xf32, #tpu.memory_space<vmem>>, %arg7: memref<16x1xf32, #tpu.memory_space<vmem>>, %arg8: memref<16x1xf32, #tpu.memory_space<vmem>>) attributes {dimension_semantics = [#tpu.dimension_semantics<parallel>, #tpu.dimension_semantics<arbitrary>], iteration_bounds = array<i64: 1, 1>, scalar_prefetch = 0 : i64, scratch_operands = 3 : i64, tpu.core_type = #tpu.core_type<tc>, window_params = [{transform_indices = @transform_0, window_bounds = array<i64: 16, 128>}, {transform_indices = @transform_1, window_bounds = array<i64: 256, 128>}, {transform_indices = @transform_2, window_bounds = array<i64: 16, 1>}, {transform_indices = @transform_3, window_bounds = array<i64: 16, 256>}]} {
    %c0_i32 = arith.constant 0 : i32
    %0 = arith.cmpi eq, %arg1, %c0_i32 : i32
    %1 = arith.extui %0 : i1 to i32
    %c0_i32_0 = arith.constant 0 : i32
    %2 = arith.cmpi ne, %1, %c0_i32_0 : i32
    scf.if %2 {
      %c0_22 = arith.constant 0 : index
      %c0_23 = arith.constant 0 : index
      %38 = vector.load %arg2[%c0_22, %c0_23] : memref<16x128xf32, #tpu.memory_space<vmem>>, vector<16x128xf32>
      %39 = arith.mulf %38, %38 : vector<16x128xf32>
      %cst_24 = arith.constant dense<0.000000e+00> : vector<16xf32>
      %40 = vector.multi_reduction <add>, %39, %cst_24 [1] : vector<16x128xf32> to vector<16xf32>
      %41 = vector.shape_cast %40 : vector<16xf32> to vector<16x1xf32>
      %cst_25 = arith.constant 1.000000e-24 : f32
      %42 = vector.broadcast %cst_25 : f32 to vector<16x1xf32>
      %43 = arith.maximumf %41, %42 : vector<16x1xf32>
      %44 = math.rsqrt %43 : vector<16x1xf32>
      %cst_26 = arith.constant 2.000000e+01 : f32
      %45 = vector.broadcast %cst_26 : f32 to vector<16x1xf32>
      %46 = arith.mulf %44, %45 : vector<16x1xf32>
      %47 = vector.broadcast %46 : vector<16x1xf32> to vector<16x128xf32>
      %48 = arith.mulf %38, %47 : vector<16x128xf32>
      %c0_27 = arith.constant 0 : index
      %c0_28 = arith.constant 0 : index
      %49 = vector.load %arg6[%c0_27, %c0_28] : memref<16x128xf32, #tpu.memory_space<vmem>>, vector<16x128xf32>
      tpu.vector_store %arg6[%c0_27, %c0_28], %48 {strides = array<i32>} : memref<16x128xf32, #tpu.memory_space<vmem>>, vector<16x128xf32>,
      %cst_29 = arith.constant 0xFF800000 : f32
      %50 = vector.broadcast %cst_29 : f32 to vector<16x1xf32>
      %c0_30 = arith.constant 0 : index
      %c0_31 = arith.constant 0 : index
      %51 = vector.load %arg7[%c0_30, %c0_31] : memref<16x1xf32, #tpu.memory_space<vmem>>, vector<16x1xf32>
      tpu.vector_store %arg7[%c0_30, %c0_31], %50 {strides = array<i32>} : memref<16x1xf32, #tpu.memory_space<vmem>>, vector<16x1xf32>,
      %cst_32 = arith.constant 0.000000e+00 : f32
      %52 = vector.broadcast %cst_32 : f32 to vector<16x1xf32>
      %c0_33 = arith.constant 0 : index
      %c0_34 = arith.constant 0 : index
      %53 = vector.load %arg8[%c0_33, %c0_34] : memref<16x1xf32, #tpu.memory_space<vmem>>, vector<16x1xf32>
      tpu.vector_store %arg8[%c0_33, %c0_34], %52 {strides = array<i32>} : memref<16x1xf32, #tpu.memory_space<vmem>>, vector<16x1xf32>,
    } else {
    }
    %c0 = arith.constant 0 : index
    %c0_1 = arith.constant 0 : index
    %3 = vector.load %arg3[%c0, %c0_1] : memref<256x128xf32, #tpu.memory_space<vmem>>, vector<256x128xf32>
    %c0_2 = arith.constant 0 : index
    %c0_3 = arith.constant 0 : index
    %4 = vector.load %arg6[%c0_2, %c0_3] : memref<16x128xf32, #tpu.memory_space<vmem>>, vector<16x128xf32>
    %cst = arith.constant dense<0.000000e+00> : vector<16x256xf32>
    %5 = tpu.matmul %4, %3, %cst {dimension_numbers = #tpu.dot_dimension_numbers<[1], [1], [0], [0], [0, 0, 1, 0], [], []>} : vector<16x128xf32>, vector<256x128xf32>, vector<16x256xf32> -> vector<16x256xf32>
    %6 = tpu.iota {dimensions = array<i32: 1>} : vector<1x256xi32>
    %c256_i32 = arith.constant 256 : i32
    %7 = arith.muli %arg1, %c256_i32 : i32
    %8 = vector.broadcast %7 : i32 to vector<1x256xi32>
    %9 = arith.addi %6, %8 : vector<1x256xi32>
    %c200_i32 = arith.constant 200 : i32
    %10 = vector.broadcast %c200_i32 : i32 to vector<1x256xi32>
    %11 = arith.cmpi slt, %9, %10 : vector<1x256xi32>
    %cst_4 = arith.constant 0.000000e+00 : f32
    %cst_5 = arith.constant -1.000000e+30 : f32
    %12 = vector.broadcast %cst_4 : f32 to vector<1x256xf32>
    %13 = vector.broadcast %cst_5 : f32 to vector<1x256xf32>
    %14 = arith.select %11, %12, %13 : vector<1x256xi1>, vector<1x256xf32>
    %15 = vector.broadcast %14 : vector<1x256xf32> to vector<16x256xf32>
    %16 = arith.addf %5, %15 : vector<16x256xf32>
    %c0_6 = arith.constant 0 : index
    %c0_7 = arith.constant 0 : index
    %17 = vector.load %arg5[%c0_6, %c0_7] : memref<16x256xf32, #tpu.memory_space<vmem>>, vector<16x256xf32>
    tpu.vector_store %arg5[%c0_6, %c0_7], %16 {strides = array<i32>} : memref<16x256xf32, #tpu.memory_space<vmem>>, vector<16x256xf32>,
    %c0_8 = arith.constant 0 : index
    %c0_9 = arith.constant 0 : index
    %18 = vector.load %arg7[%c0_8, %c0_9] : memref<16x1xf32, #tpu.memory_space<vmem>>, vector<16x1xf32>
    %cst_10 = arith.constant dense<0xFF800000> : vector<16xf32>
    %19 = vector.multi_reduction <maximumf>, %16, %cst_10 [1] : vector<16x256xf32> to vector<16xf32>
    %20 = vector.shape_cast %19 : vector<16xf32> to vector<16x1xf32>
    %21 = arith.maximumf %18, %20 : vector<16x1xf32>
    %c0_11 = arith.constant 0 : index
    %c0_12 = arith.constant 0 : index
    %22 = vector.load %arg7[%c0_11, %c0_12] : memref<16x1xf32, #tpu.memory_space<vmem>>, vector<16x1xf32>
    %23 = arith.subf %22, %21 : vector<16x1xf32>
    %24 = math.exp %23 : vector<16x1xf32>
    %25 = vector.broadcast %21 : vector<16x1xf32> to vector<16x256xf32>
    %26 = arith.subf %16, %25 : vector<16x256xf32>
    %27 = math.exp %26 : vector<16x256xf32>
    %c0_13 = arith.constant 0 : index
    %c0_14 = arith.constant 0 : index
    %28 = vector.load %arg8[%c0_13, %c0_14] : memref<16x1xf32, #tpu.memory_space<vmem>>, vector<16x1xf32>
    %29 = arith.mulf %24, %28 : vector<16x1xf32>
    %cst_15 = arith.constant dense<0.000000e+00> : vector<16xf32>
    %30 = vector.multi_reduction <add>, %27, %cst_15 [1] : vector<16x256xf32> to vector<16xf32>
    %31 = vector.shape_cast %30 : vector<16xf32> to vector<16x1xf32>
    %32 = arith.addf %29, %31 : vector<16x1xf32>
    %c0_16 = arith.constant 0 : index
    %c0_17 = arith.constant 0 : index
    %33 = vector.load %arg8[%c0_16, %c0_17] : memref<16x1xf32, #tpu.memory_space<vmem>>, vector<16x1xf32>
    tpu.vector_store %arg8[%c0_16, %c0_17], %32 {strides = array<i32>} : memref<16x1xf32, #tpu.memory_space<vmem>>, vector<16x1xf32>,
    %c0_18 = arith.constant 0 : index
    %c0_19 = arith.constant 0 : index
    %34 = vector.load %arg7[%c0_18, %c0_19] : memref<16x1xf32, #tpu.memory_space<vmem>>, vector<16x1xf32>
    tpu.vector_store %arg7[%c0_18, %c0_19], %21 {strides = array<i32>} : memref<16x1xf32, #tpu.memory_space<vmem>>, vector<16x1xf32>,
    %c0_i32_20 = arith.constant 0 : i32
    %35 = arith.cmpi eq, %arg1, %c0_i32_20 : i32
    %36 = arith.extui %35 : i1 to i32
    %c0_i32_21 = arith.constant 0 : i32
    %37 = arith.cmpi ne, %36, %c0_i32_21 : i32
    scf.if %37 {
      %c0_22 = arith.constant 0 : index
      %c0_23 = arith.constant 0 : index
      %38 = vector.load %arg7[%c0_22, %c0_23] : memref<16x1xf32, #tpu.memory_space<vmem>>, vector<16x1xf32>
      %c0_24 = arith.constant 0 : index
      %c0_25 = arith.constant 0 : index
      %39 = vector.load %arg8[%c0_24, %c0_25] : memref<16x1xf32, #tpu.memory_space<vmem>>, vector<16x1xf32>
      %40 = math.log %39 : vector<16x1xf32>
      %41 = arith.addf %38, %40 : vector<16x1xf32>
      %c0_26 = arith.constant 0 : index
      %c0_27 = arith.constant 0 : index
      %42 = vector.load %arg4[%c0_26, %c0_27] : memref<16x1xf32, #tpu.memory_space<vmem>>, vector<16x1xf32>
      tpu.vector_store %arg4[%c0_26, %c0_27], %41 {strides = array<i32>} : memref<16x1xf32, #tpu.memory_space<vmem>>, vector<16x1xf32>,
    } else {
    }
    return
  }
  func.func @transform_0(%arg0: i32, %arg1: i32) -> (i32, i32) {
    %c0_i32 = arith.constant 0 : i32
    %c0_i32_0 = arith.constant 0 : i32
    return %arg0, %c0_i32 : i32, i32
  }
  func.func @transform_1(%arg0: i32, %arg1: i32) -> (i32, i32) {
    %c0_i32 = arith.constant 0 : i32
    %c0_i32_0 = arith.constant 0 : i32
    return %arg1, %c0_i32 : i32, i32
  }
  func.func @transform_2(%arg0: i32, %arg1: i32) -> (i32, i32) {
    %c0_i32 = arith.constant 0 : i32
    %c0_i32_0 = arith.constant 0 : i32
    return %arg0, %c0_i32 : i32, i32
  }
  func.func @transform_3(%arg0: i32, %arg1: i32) -> (i32, i32) {
    %c0_i32 = arith.constant 0 : i32
    return %arg0, %arg1 : i32, i32
  }
}

</mosaic_0001>

<bundles_post_ra>
// kernel: tpu_custom_call.1
= control target key start
LH: loop header
LB: loop body
LE: loop exit
PB: predicated region body
PF: predicated region fallthrough
CT: control target
= control target key end

     0   :  { %9 = vsyncpa [#allocation6], 0  ;;  %s569_s0 = inlined_call_operand.hbm [shape: f32[16,128], index: 0, kind: input, shape index: {}]   ;;  %s570_s1 = inlined_call_operand.hbm [shape: f32[256,128], index: 1, kind: input, shape index: {}]   ;;  %s571_s2 = inlined_call_operand.vmem [shape: f32[16,1], index: 2, kind: output, shape index: {0}]   ;;  %s572_s3 = inlined_call_operand.hbm [shape: f32[16,256], index: 3, kind: output, shape index: {1}]  }
   0x1   :  { %10 = vsyncpa [#allocation9], 0 }
   0x2   :  { %11 = vsyncpa [#allocation7], 0  ;;  %s476_s12 = smov [#allocation5]   ;;  %s404_s16 = scalar_lea.hbm %s569_s0, 256 }
   0x3   :  { %s17_s13 = sshll.u32 %s476_s12, 4  ;;  %p405_p0 = scmp.ne.s32.totalorder %s569_s0, %s404_s16  ;;  %s18_s13 = int_to_ptr.vmem [resolvable:$true] %s17_s13 }
   0x4   :  { %p408_p1 = scmp.lt.u32.totalorder %s404_s16, %s569_s0 }
   0x6   :  { %p410_p2 = pnand %p408_p1, %p405_p0 }
   0x8   :  { %413 = shalt.err (!%p410_p2)
}
   0x9   :  { %s414_s21 = scalar_lea.vmem %s18_s13, 256  ;;  %p419_p4 = scmp.lt.s32.totalorder %s18_s13, %s18_s13 }
   0xa   :  { %p415_p3 = scmp.ne.s32.totalorder %s18_s13, %s414_s21  ;;  %p420_p5 = scmp.lt.s32.totalorder %s414_s21, %s414_s21 }
   0xc   :  { %p421_p6 = por %p420_p5, %p419_p4 }
   0xe   :  { %p422_p7 = pnand %p421_p6, %p415_p3 }
  0x10   :  { %425 = shalt.err (!%p422_p7)
}
  0x11   :  { %s477_s22 = smov 128   ;;  %s478_s23 = smov 8  }
  0x12   :  { %23 = dma.hbm_to_vmem [thread:$0]  %s569_s0, 256, %s18_s13, [#allocation6], %s477_s22, %s477_s22, %s478_s23  }
  0x13   :  { %s479_s26 = smov [#allocation8]   ;;  %s426_s30 = scalar_lea.hbm %s570_s1, 4096 }
  0x14   :  { %s29_s27 = sshll.u32 %s479_s26, 4  ;;  %p427_p8 = scmp.ne.s32.totalorder %s570_s1, %s426_s30  ;;  %s30_s27 = int_to_ptr.vmem [resolvable:$true] %s29_s27 }
  0x15   :  { %p430_p9 = scmp.lt.u32.totalorder %s426_s30, %s570_s1 }
  0x17   :  { %p432_p10 = pnand %p430_p9, %p427_p8 }
  0x19   :  { %435 = shalt.err (!%p432_p10)
}
  0x1a   :  { %s436_s8 = scalar_lea.vmem %s30_s27, 4096  ;;  %p441_p12 = scmp.lt.s32.totalorder %s30_s27, %s30_s27 }
  0x1b   :  { %p437_p11 = scmp.ne.s32.totalorder %s30_s27, %s436_s8  ;;  %p442_p13 = scmp.lt.s32.totalorder %s436_s8, %s436_s8 }
  0x1d   :  { %p443_p0 = por %p442_p13, %p441_p12 }
  0x1f   :  { %p444_p1 = pnand %p443_p0, %p437_p11 }
  0x21   :  { %447 = shalt.err (!%p444_p1)
}
  0x22   :  { %35 = dma.hbm_to_vmem [thread:$0]  %s570_s1, 4096, %s30_s27, [#allocation9], %s477_s22, %s477_s22, %s478_s23  }
  0x23   :  { %470 = dma.done.wait [#allocation6], 256  }
  0x24   :  { %471 = vsyncadd [#allocation6], 4294967040 }
  0x25   :  { %472 = dma.done.wait [#allocation9], 4096  }
  0x26   :  { %473 = vsyncadd [#allocation9], 4294963200  ;;  %v531_v0 = vld [vmem:[#allocation5] sm:$0xff]  ;;  %v533_v1 = vld [vmem:[#allocation5 + $0x8] sm:$0xff]  ;;  %vm64_vm0 = vcmask 7168   ;;  %v480_v62 = vmov -inf   ;;  %v103_v63 = vlaneseq }
  0x27   :  { %v85_v2 = vld [vmem:[#allocation8 + $0x80] sm:$0xff]  ;;  %v48_v3 = vmul.f32 %v531_v0, %v531_v0  ;;  %v86_v4 = vld [vmem:[#allocation8 + $0x88] sm:$0xff]  ;;  %v87_v9 = vld [vmem:[#allocation8 + $0x90] sm:$0xff]  ;;  %v49_v11 = vmul.f32 %v533_v1, %v533_v1  ;;  %65 = vst.msk [vmem:[#allocation3] sm:$0xff] %vm64_vm0, %v480_v62  ;;  %s484_s1 = smov [#allocation10]  }
  0x28   :  { %v69_v5 = vld [vmem:[#allocation8] sm:$0xff]  ;;  %v70_v6 = vld [vmem:[#allocation8 + $0x8] sm:$0xff]  ;;  %v323_v7 = vpack.c.bf16 %v86_v4, %v85_v2  ;;  %v88_v10 = vld [vmem:[#allocation8 + $0x98] sm:$0xff]  ;;  %66 = vst.msk [vmem:[#allocation3 + $0x8] sm:$0xff] %vm64_vm0, %v480_v62  ;;  %v104_v2 = vand.u32 127, %v103_v63  ;;  %s272_s10 = sshll.u32 %s484_s1, 4  ;;  %s273_s10 = int_to_ptr.vmem [resolvable:$true] %s272_s10 }
  0x29   :  { %v325_v8 = vpack.c.bf16 %v70_v6, %v69_v5  ;;  %50 = vadd.xlane.f32.xlu0 %v48_v3  ;;  %v327_v12 = vpack.c.bf16 %v88_v10, %v87_v9  ;;  %v71_v13 = vld [vmem:[#allocation8 + $0x10] sm:$0xff]  ;;  %v72_v14 = vld [vmem:[#allocation8 + $0x18] sm:$0xff]  ;;  %v89_v15 = vld [vmem:[#allocation8 + $0xa0] sm:$0xff]  ;;  %v481_v4 = vmov -1e+30   ;;  %s448_s11 = scalar_lea.vmem %s273_s10, 512  ;;  %p453_p3 = scmp.lt.s32.totalorder %s273_s10, %s273_s10 }
  0x2a   :  { %324 = vmatprep.subr.bf16.mxu0 %v323_v7  ;;  %355 = vmatprep.subr.bf16.mxu1 %v323_v7  ;;  %v90_v16 = vld [vmem:[#allocation8 + $0xa8] sm:$0xff]  ;;  %v329_v17 = vpack.c.bf16 %v72_v14, %v71_v13  ;;  %v73_v19 = vld [vmem:[#allocation8 + $0x20] sm:$0xff]  ;;  %v91_v21 = vld [vmem:[#allocation8 + $0xb0] sm:$0xff]  ;;  %v105_v3 = vadd.s32 128, %v104_v2  ;;  %v483_v13 = vmov 0.0   ;;  %p449_p2 = scmp.ne.s32.totalorder %s273_s10, %s448_s11  ;;  %p454_p4 = scmp.lt.s32.totalorder %s448_s11, %s448_s11 }
  0x2b   :  { %326 = vmatpush3.bf16.xpose.msra.mxu0 %v325_v8  ;;  %363 = vmatpush3.bf16.xpose.msra.mxu1 %v325_v8  ;;  %v331_v18 = vpack.c.bf16 %v90_v16, %v89_v15  ;;  %v74_v20 = vld [vmem:[#allocation8 + $0x28] sm:$0xff]  ;;  %v92_v22 = vld [vmem:[#allocation8 + $0xb8] sm:$0xff]  ;;  %v75_v25 = vld [vmem:[#allocation8 + $0x30] sm:$0xff]  ;;  %67 = vst.msk [vmem:[#allocation4] sm:$0xff] %vm64_vm0, %v483_v13 }
  0x2c   :  { %328 = vmatprep.subr.bf16.mxu0 %v327_v12  ;;  %356 = vmatprep.subr.bf16.mxu1 %v327_v12  ;;  %v333_v23 = vpack.c.bf16 %v74_v20, %v73_v19  ;;  %v335_v24 = vpack.c.bf16 %v92_v22, %v91_v21  ;;  %v76_v26 = vld [vmem:[#allocation8 + $0x38] sm:$0xff]  ;;  %v93_v27 = vld [vmem:[#allocation8 + $0xc0] sm:$0xff]  ;;  %v94_v28 = vld [vmem:[#allocation8 + $0xc8] sm:$0xff]  ;;  %vm111_vm1 = vcmp.lt.s32.totalorder %v105_v3, 200  ;;  %v482_v12 = vmov 0   ;;  %68 = vst.msk [vmem:[#allocation4 + $0x8] sm:$0xff] %vm64_vm0, %v483_v13  ;;  %p455_p5 = por %p454_p4, %p453_p3 }
  0x2d   :  { %52 = vadd.xlane.f32.xlu0 %v49_v11  ;;  %v337_v29 = vpack.c.bf16 %v76_v26, %v75_v25  ;;  %v339_v30 = vpack.c.bf16 %v94_v28, %v93_v27  ;;  %v77_v31 = vld [vmem:[#allocation8 + $0x40] sm:$0xff]  ;;  %v78_v32 = vld [vmem:[#allocation8 + $0x48] sm:$0xff]  ;;  %v95_v33 = vld [vmem:[#allocation8 + $0xd0] sm:$0xff]  ;;  %383 = vset.pattern.permute.xlu1 %v482_v12 }
  0x2e   :  { %v96_v34 = vld [vmem:[#allocation8 + $0xd8] sm:$0xff]  ;;  %v341_v35 = vpack.c.bf16 %v78_v32, %v77_v31  ;;  %v79_v37 = vld [vmem:[#allocation8 + $0x50] sm:$0xff]  ;;  %v97_v39 = vld [vmem:[#allocation8 + $0xe0] sm:$0xff]  ;;  %382 = vset.pattern.permute.xlu0 %v482_v12  ;;  %p456_p6 = pnand %p455_p5, %p449_p2 }
  0x2f   :  { %v343_v36 = vpack.c.bf16 %v96_v34, %v95_v33  ;;  %v80_v38 = vld [vmem:[#allocation8 + $0x58] sm:$0xff]  ;;  %v98_v40 = vld [vmem:[#allocation8 + $0xe8] sm:$0xff]  ;;  %v81_v43 = vld [vmem:[#allocation8 + $0x60] sm:$0xff] }
  0x30   :  { %v345_v41 = vpack.c.bf16 %v80_v38, %v79_v37  ;;  %v347_v42 = vpack.c.bf16 %v98_v40, %v97_v39  ;;  %v82_v44 = vld [vmem:[#allocation8 + $0x68] sm:$0xff]  ;;  %v99_v45 = vld [vmem:[#allocation8 + $0xf0] sm:$0xff]  ;;  %v100_v46 = vld [vmem:[#allocation8 + $0xf8] sm:$0xff] }
  0x31   :  { %v349_v47 = vpack.c.bf16 %v82_v44, %v81_v43  ;;  %v351_v48 = vpack.c.bf16 %v100_v46, %v99_v45  ;;  %v83_v49 = vld [vmem:[#allocation8 + $0x70] sm:$0xff]  ;;  %v84_v50 = vld [vmem:[#allocation8 + $0x78] sm:$0xff] }
  0x32   :  { %v353_v51 = vpack.c.bf16 %v84_v50, %v83_v49  ;;  %v195_v14 = vld [vmem:[#allocation3] sm:$0xff] }
  0x33   :  { %330 = vmatpush3.bf16.xpose.msra.mxu0 %v329_v17  ;;  %364 = vmatpush3.bf16.xpose.msra.mxu1 %v329_v17  ;;  %v196_v17 = vld [vmem:[#allocation3 + $0x8] sm:$0xff] }
  0x34   :  { %332 = vmatprep.subr.bf16.mxu0 %v331_v18  ;;  %357 = vmatprep.subr.bf16.mxu1 %v331_v18 }
  0x3b   :  { %334 = vmatpush3.bf16.xpose.msra.mxu0 %v333_v23  ;;  %365 = vmatpush3.bf16.xpose.msra.mxu1 %v333_v23 }
  0x3c   :  { %336 = vmatprep.subr.bf16.mxu0 %v335_v24  ;;  %358 = vmatprep.subr.bf16.mxu1 %v335_v24 }
  0x43   :  { %338 = vmatpush3.bf16.xpose.msra.mxu0 %v337_v29  ;;  %366 = vmatpush3.bf16.xpose.msra.mxu1 %v337_v29 }
  0x44   :  { %340 = vmatprep.subr.bf16.mxu0 %v339_v30  ;;  %359 = vmatprep.subr.bf16.mxu1 %v339_v30 }
  0x4b   :  { %342 = vmatpush3.bf16.xpose.msra.mxu0 %v341_v35  ;;  %367 = vmatpush3.bf16.xpose.msra.mxu1 %v341_v35 }
  0x4c   :  { %344 = vmatprep.subr.bf16.mxu0 %v343_v36  ;;  %360 = vmatprep.subr.bf16.mxu1 %v343_v36 }
  0x53   :  { %346 = vmatpush3.bf16.xpose.msra.mxu0 %v345_v41  ;;  %368 = vmatpush3.bf16.xpose.msra.mxu1 %v345_v41 }
  0x54   :  { %348 = vmatprep.subr.bf16.mxu0 %v347_v42  ;;  %361 = vmatprep.subr.bf16.mxu1 %v347_v42 }
  0x5b   :  { %350 = vmatpush3.bf16.xpose.msra.mxu0 %v349_v47  ;;  %369 = vmatpush3.bf16.xpose.msra.mxu1 %v349_v47 }
  0x5c   :  { %352 = vmatprep.subr.bf16.mxu0 %v351_v48  ;;  %362 = vmatprep.subr.bf16.mxu1 %v351_v48 }
  0x63   :  { %354 = vmatpush3.bf16.xpose.msra.mxu0 %v353_v51  ;;  %370 = vmatpush3.bf16.xpose.msra.mxu1 %v353_v51 }
  0xb6   :  { %v51_v52 = vpop.xlane.xlu0 %50 }
  0xb7   :  { %v54_v53 = vmax.f32 %v51_v52, 1e-24 }
  0xb9   :  { %384 = vrsqrt.f32 %v54_v53 }
  0xba   :  { %v53_v54 = vpop.xlane.xlu0 %52 }
  0xbb   :  { %v55_v55 = vmax.f32 %v53_v54, 1e-24 }
  0xbd   :  { %386 = vrsqrt.f32 %v55_v55 }
  0xc3   :  { %v385_v56 = vpop.eup %384 }
  0xc4   :  { %v58_v57 = vmul.f32 20.0, %v385_v56 }
  0xc6   :  { %v60_v58 = vmul.f32 %v58_v57, %v531_v0  ;;  %v113_v0 = vsel %vm111_vm1, 0.0, %v481_v4 }
  0xc7   :  { %v387_v59 = vpop.eup %386 }
  0xc8   :  { %319 = vmatprep.mubr.f32.mxu0 %v60_v58  ;;  %v59_v60 = vmul.f32 20.0, %v387_v59 }
  0xc9   :  { %320 = vmatmul.mubr.f32.vlgmr.msra.gmra.mrb[0].mxu0 %v60_v58 }
  0xca   :  { %v61_v61 = vmul.f32 %v59_v60, %v533_v1 }
  0xcc   :  { %321 = vmatprep.mubr.f32.mxu1 %v61_v61 }
  0xcd   :  { %322 = vmatmul.mubr.f32.vlgmr.msra.gmra.mrb[0].mxu1 %v61_v61 }
 0x19c   :  { %v180_v5 = vpop.f32.mrb[0].mxu0 }
 0x19d   :  { %191 = vst [vmem:[#allocation10] sm:$0xff] %v180_v5  ;;  %v182_v6 = vpop.f32.mrb[1].mxu0 }
 0x19e   :  { %v183_v7 = vadd.f32 %v182_v6, %v113_v0 }
 0x1a0   :  { %192 = vst [vmem:[#allocation10 + $0x8] sm:$0xff] %v183_v7  ;;  %v186_v1 = vpop.f32.mrb[0].mxu1  ;;  %v197_v8 = vmax.f32 %v180_v5, %v183_v7 }
 0x1a1   :  { %193 = vst [vmem:[#allocation10 + $0x10] sm:$0xff] %v186_v1  ;;  %v188_v9 = vpop.f32.mrb[1].mxu1 }
 0x1a2   :  { %v189_v10 = vadd.f32 %v188_v9, %v113_v0  ;;  %198 = vmax.xlane.f32.xlu1 %v197_v8 }
 0x1a4   :  { %194 = vst [vmem:[#allocation10 + $0x18] sm:$0xff] %v189_v10  ;;  %v200_v11 = vmax.f32 %v186_v1, %v189_v10 }
 0x1a6   :  { %201 = vmax.xlane.f32.xlu1 %v200_v11 }
 0x22f   :  { %v199_v15 = vpop.xlane.xlu1 %198 }
 0x230   :  { %v203_v16 = vmax.f32 %v195_v14, %v199_v15 }
 0x232   :  { %v205_v18 = vsub.f32 %v195_v14, %v203_v16  ;;  %248 = vst.msk [vmem:[#allocation3] sm:$0xff] %vm64_vm0, %v203_v16  ;;  %213 = vperm.xlu0 %382, %v203_v16  }
 0x233   :  { %v202_v19 = vpop.xlane.xlu1 %201 }
 0x234   :  { %v204_v20 = vmax.f32 %v196_v17, %v202_v19 }
 0x236   :  { %v206_v21 = vsub.f32 %v196_v17, %v204_v20  ;;  %249 = vst.msk [vmem:[#allocation3 + $0x8] sm:$0xff] %vm64_vm0, %v204_v20  ;;  %218 = vperm.xlu1 %383, %v204_v20  }
 0x2b1   :  { %v214_v22 = vpop.permute.xlu0 %213 }
 0x2b2   :  { %v221_v23 = vsub.f32 %v180_v5, %v214_v22  ;;  %v222_v24 = vsub.f32 %v183_v7, %v214_v22 }
 0x2b4   :  { %v225_v25 = vmul.f32 1.442695, %v221_v23  ;;  %v227_v26 = vmul.f32 1.442695, %v222_v24 }
 0x2b5   :  { %v219_v27 = vpop.permute.xlu1 %218 }
 0x2b6   :  { %388 = vpow2.f32 %v225_v25  ;;  %v223_v28 = vsub.f32 %v186_v1, %v219_v27  ;;  %v224_v29 = vsub.f32 %v189_v10, %v219_v27 }
 0x2b7   :  { %390 = vpow2.f32 %v227_v26 }
 0x2b8   :  { %v229_v30 = vmul.f32 1.442695, %v223_v28  ;;  %v231_v31 = vmul.f32 1.442695, %v224_v29 }
 0x2ba   :  { %392 = vpow2.f32 %v229_v30 }
 0x2bb   :  { %394 = vpow2.f32 %v231_v31 }
 0x2c0   :  { %v389_v32 = vpop.eup %388 }
 0x2c1   :  { %v391_v33 = vpop.eup %390 }
 0x2c2   :  { %v237_v34 = vadd.f32 %v391_v33, %v389_v32 }
 0x2c4   :  { %v393_v35 = vpop.eup %392  ;;  %238 = vadd.xlane.f32.xlu1 %v237_v34 }
 0x2c5   :  { %v395_v36 = vpop.eup %394 }
 0x2c6   :  { %v240_v37 = vadd.f32 %v395_v36, %v393_v35 }
 0x2c8   :  { %241 = vadd.xlane.f32.xlu0 %v240_v37 }
 0x2c9   :  { %459 = shalt.err (!%p456_p6)
}
 0x2ca   :  { %s460_s14 = scalar_lea.hbm %s572_s3, 512 }
 0x2cb   :  { %p461_p7 = scmp.ne.s32.totalorder %s572_s3, %s460_s14  ;;  %p464_p8 = scmp.lt.u32.totalorder %s460_s14, %s572_s3 }
 0x2cd   :  { %p466_p9 = pnand %p464_p8, %p461_p7 }
 0x2cf   :  { %469 = shalt.err (!%p466_p9)
}
 0x2d0   :  { %s485_s19 = smov 256   ;;  %s486_s20 = smov 16   ;;  %v207_v38 = vmul.f32 1.442695, %v205_v18  ;;  %v209_v39 = vmul.f32 1.442695, %v206_v21 }
 0x2d1   :  { %278 = dma.vmem_to_hbm [thread:$0]  %s273_s10, 512, %s572_s3, [#allocation7], %s485_s19, %s485_s19, %s486_s20   ;;  %v233_v41 = vld [vmem:[#allocation4] sm:$0xff]  ;;  %v234_v45 = vld [vmem:[#allocation4 + $0x8] sm:$0xff]  ;;  %v253_v54 = vld [vmem:[#allocation3] sm:$0xff] }
 0x2d2   :  { %396 = vpow2.f32 %v207_v38  ;;  %v254_v58 = vld [vmem:[#allocation3 + $0x8] sm:$0xff] }
 0x2d3   :  { %398 = vpow2.f32 %v209_v39 }
 0x2dc   :  { %v397_v40 = vpop.eup %396 }
 0x2dd   :  { %v235_v42 = vmul.f32 %v397_v40, %v233_v41  ;;  %v399_v43 = vpop.eup %398 }
 0x2de   :  { %v236_v47 = vmul.f32 %v399_v43, %v234_v45 }
 0x351   :  { %v239_v44 = vpop.xlane.xlu1 %238 }
 0x352   :  { %v243_v46 = vadd.f32 %v239_v44, %v235_v42 }
 0x354   :  { %246 = vst.msk [vmem:[#allocation4] sm:$0xff] %vm64_vm0, %v243_v46 }
 0x355   :  { %v242_v48 = vpop.xlane.xlu0 %241 }
 0x356   :  { %v244_v49 = vadd.f32 %v242_v48, %v236_v47 }
 0x358   :  { %247 = vst.msk [vmem:[#allocation4 + $0x8] sm:$0xff] %vm64_vm0, %v244_v49 }
 0x35b   :  { %v255_v50 = vld [vmem:[#allocation4] sm:$0xff] }
 0x35c   :  { %400 = vlog2.f32 %v255_v50 }
 0x35f   :  { %v256_v51 = vld [vmem:[#allocation4 + $0x8] sm:$0xff] }
 0x360   :  { %402 = vlog2.f32 %v256_v51 }
 0x366   :  { %v401_v52 = vpop.eup %400 }
 0x367   :  { %v258_v53 = vmul.f32 0.6931472, %v401_v52 }
 0x369   :  { %v261_v55 = vadd.f32 %v258_v53, %v253_v54 }
 0x36a   :  { %v403_v56 = vpop.eup %402 }
 0x36b   :  { %263 = vst.msk [vmem:[%s571_s2] sm:$0xff] %vm64_vm0, %v261_v55  ;;  %v260_v57 = vmul.f32 0.6931472, %v403_v56 }
 0x36d   :  { %v262_v59 = vadd.f32 %v260_v57, %v254_v58 }
 0x36f   :  { %264 = vst.msk [vmem:[%s571_s2 + $0x8] sm:$0xff] %vm64_vm0, %v262_v59 }
 0x370   :  { %474 = dma.done.wait [#allocation7], 512  }
 0x371   :  { %475 = vsyncadd [#allocation7], 4294966784 }
 0x372   :  { %284 = vsyncpa [#allocation6], 1 }
 0x373   :  { %285 = vsyncpa [#allocation9], 1 }
 0x374   :  { %286 = vsyncpa [#allocation7], 1 }

</bundles_post_ra>
